<compile_context>
chip_gen: v7x
topology: tpu7x:2x2x1
jax: 0.10.0
libtpu: 0.0.40
codegen_flags: <defaults>
</compile_context>

<pallas_src>
import math
import functools

import jax
import jax.numpy as jnp
from jax import lax
from jax.experimental import pallas as pl
from jax.experimental.pallas import tpu as pltpu


# ---------------------------------------------------------------------------
# helpers
# ---------------------------------------------------------------------------
def _pick_tile(s, cap):
    for t in (cap, 512, 256, 128, 64, 32, 16, 8):
        if t <= s and s % t == 0:
            return t
    return s


def _vmem_limit_bytes():
    """~75% of physical VMEM, capped at 100 MiB (safe on v5e/v6e 128MiB and v7x 64MiB)."""
    try:
        cap = int(pltpu.get_tpu_info().vmem_capacity_bytes)
    except Exception:
        cap = 64 * 1024 * 1024
    return max(32 * 1024 * 1024, min((cap * 3) // 4, 100 * 1024 * 1024))


# ---------------------------------------------------------------------------
# Kernel 1: fused Q/K/V projection (runs once per (batch, seq-tile))
# ---------------------------------------------------------------------------
def qkv_proj_kernel(xq_ref, xk_ref, xv_ref,
                    wq_ref, wk_ref, wv_ref,
                    bq_ref, bk_ref, bv_ref,
                    q_ref, k_ref, v_ref):
    q = lax.dot(xq_ref[...], wq_ref[...], preferred_element_type=jnp.float32)
    k = lax.dot(xk_ref[...], wk_ref[...], preferred_element_type=jnp.float32)
    v = lax.dot(xv_ref[...], wv_ref[...], preferred_element_type=jnp.float32)
    q_ref[...] = (q + bq_ref[...]).astype(q_ref.dtype)   # wq/bq already carry 1/sqrt(d_k)
    k_ref[...] = (k + bk_ref[...]).astype(k_ref.dtype)
    v_ref[...] = (v + bv_ref[...]).astype(v_ref.dtype)


def qkv_projection(xq, xk, xv, prepared, *, seq_tile, vmem_limit):
    B, S, D = xq.shape
    ts = _pick_tile(S, seq_tile)
    n_s = S // ts

    act_spec = pl.BlockSpec((None, ts, D), lambda b, si: (b, si, 0))
    # Constant index maps: weights/biases are DMA'd once and stay VMEM-resident.
    w_spec = pl.BlockSpec((D, D), lambda b, si: (0, 0))
    b_spec = pl.BlockSpec((1, D), lambda b, si: (0, 0))
    out_spec = pl.BlockSpec((None, ts, D), lambda b, si: (b, si, 0))

    out_sds = jax.ShapeDtypeStruct((B, S, D), jnp.bfloat16)
    return pl.pallas_call(
        qkv_proj_kernel,
        out_shape=(out_sds, out_sds, out_sds),
        grid_spec=pltpu.PrefetchScalarGridSpec(
            num_scalar_prefetch=0,
            grid=(B, n_s),
            in_specs=[act_spec, act_spec, act_spec,
                      w_spec, w_spec, w_spec,
                      b_spec, b_spec, b_spec],
            out_specs=[out_spec, out_spec, out_spec],
        ),
        compiler_params=pltpu.CompilerParams(
            dimension_semantics=("parallel", "parallel"),
            vmem_limit_bytes=vmem_limit),
    )(xq, xk, xv,
      prepared["wq"], prepared["wk"], prepared["wv"],
      prepared["bq"], prepared["bk"], prepared["bv"])


# ---------------------------------------------------------------------------
# Kernel 2: flash attention (online softmax over KV tiles) + fused out-projection
# ---------------------------------------------------------------------------
def flash_attn_out_kernel(q_ref, k_ref, v_ref, wo_ref, bo_ref, o_ref,
                          m_scr, l_scr, acc_scr, *, h, d_k):
    ki = pl.program_id(2)
    n_kv = pl.num_programs(2)

    @pl.when(ki == 0)
    def _init():
        m_scr[...] = jnp.full(m_scr.shape, -jnp.inf, jnp.float32)
        l_scr[...] = jnp.zeros(l_scr.shape, jnp.float32)
        acc_scr[...] = jnp.zeros(acc_scr.shape, jnp.float32)

    # Per-head online softmax; head hd lives in the static lane slice
    # [hd*d_k, (hd+1)*d_k) of the lane-dense (tq, D) / (tk, D) tiles.
    # Each iteration stores its state back into scratch immediately so only one
    # (tq, tk) score/prob pair needs to be in flight at a time.
    for hd in range(h):
        lo = hd * d_k
        q_h = q_ref[:, lo:lo + d_k]          # (tq, d_k) bf16, pre-scaled
        k_h = k_ref[:, lo:lo + d_k]          # (tk, d_k) bf16
        v_h = v_ref[:, lo:lo + d_k]          # (tk, d_k) bf16

        # contract last dims of both operands -> no explicit transpose
        s = lax.dot_general(q_h, k_h, (((1,), (1,)), ((), ())),
                            preferred_element_type=jnp.float32)     # (tq, tk)

        m_prev = m_scr[:, hd:hd + 1]                                 # (tq, 1)
        m_new = jnp.maximum(m_prev, jnp.max(s, axis=-1, keepdims=True))
        alpha = jnp.exp(m_prev - m_new)                              # (tq, 1)
        p = jnp.exp(s - m_new)                                       # (tq, tk)

        l_scr[:, hd:hd + 1] = alpha * l_scr[:, hd:hd + 1] + \
            jnp.sum(p, axis=-1, keepdims=True)
        acc_scr[:, lo:lo + d_k] = alpha * acc_scr[:, lo:lo + d_k] + lax.dot(
            p.astype(jnp.bfloat16), v_h, preferred_element_type=jnp.float32)
        m_scr[:, hd:hd + 1] = m_new

    # Last KV tile: normalize per head into a lane-dense bf16 context tile and do
    # ONE full-depth (tq, D) @ (D, D) matmul against wo (lane-dense output store).
    @pl.when(ki == n_kv - 1)
    def _finalize():
        tq = acc_scr.shape[0]
        inv_l = pl.reciprocal(l_scr[...], approx=True)               # (tq, h)
        inv_full = jnp.concatenate(
            [jnp.broadcast_to(inv_l[:, hd:hd + 1], (tq, d_k)) for hd in range(h)],
            axis=-1)                                                 # (tq, D)
        ctx = (acc_scr[...] * inv_full).astype(jnp.bfloat16)         # (tq, D)
        o_ref[...] = (lax.dot(ctx, wo_ref[...], preferred_element_type=jnp.float32)
                      + bo_ref[...]).astype(o_ref.dtype)


def flash_attention_outproj(q, k, v, prepared, *, h, q_tile, kv_tile, vmem_limit):
    B, S, D = q.shape
    d_k = D // h
    tq = _pick_tile(S, q_tile)
    tk = _pick_tile(S, kv_tile)
    n_q = S // tq
    n_kv = S // tk

    q_spec = pl.BlockSpec((None, tq, D), lambda b, qi, ki: (b, qi, 0))
    kv_spec = pl.BlockSpec((None, tk, D), lambda b, qi, ki: (b, ki, 0))
    wo_spec = pl.BlockSpec((D, D), lambda b, qi, ki: (0, 0))
    bo_spec = pl.BlockSpec((1, D), lambda b, qi, ki: (0, 0))
    out_spec = pl.BlockSpec((None, tq, D), lambda b, qi, ki: (b, qi, 0))

    kernel = functools.partial(flash_attn_out_kernel, h=h, d_k=d_k)

    # Note: B * n_q are the "parallel" axes (megacore sharding on v7x); keep them >= 2
    # for real workloads so both TensorCores stay busy.
    return pl.pallas_call(
        kernel,
        out_shape=jax.ShapeDtypeStruct((B, S, D), jnp.float32),
        grid_spec=pltpu.PrefetchScalarGridSpec(
            num_scalar_prefetch=0,
            grid=(B, n_q, n_kv),
            in_specs=[q_spec, kv_spec, kv_spec, wo_spec, bo_spec],
            out_specs=out_spec,
            scratch_shapes=[
                pltpu.VMEM((tq, h), jnp.float32),   # running max (per head column)
                pltpu.VMEM((tq, h), jnp.float32),   # running denominator
                pltpu.VMEM((tq, D), jnp.float32),   # running numerator, lane-dense
            ],
        ),
        compiler_params=pltpu.CompilerParams(
            dimension_semantics=("parallel", "parallel", "arbitrary"),
            vmem_limit_bytes=vmem_limit),
    )(q, k, v, prepared["wo"], prepared["bo"])


# ---------------------------------------------------------------------------
# Host-side wrapper + one-time weight repack
# ---------------------------------------------------------------------------
def prepare_params(params, *, h):
    """One-time repack of PyTorch-layout weights into kernel layout.

    PyTorch Linear stores W as (out, in) and computes x @ W.T + b.  Transposes,
    bf16 casts and the 1/sqrt(d_k) scale fold (into wq/bq) happen here once.
    """
    D = params["wq"].shape[0]
    d_k = D // h
    scale = 1.0 / math.sqrt(d_k)
    return {
        "wq": (params["wq"].T * scale).astype(jnp.bfloat16),   # (D, D), scale folded
        "bq": (params["bq"] * scale).reshape(1, D).astype(jnp.float32),
        "wk": params["wk"].T.astype(jnp.bfloat16),
        "bk": params["bk"].reshape(1, D).astype(jnp.float32),
        "wv": params["wv"].T.astype(jnp.bfloat16),
        "bv": params["bv"].reshape(1, D).astype(jnp.float32),
        "wo": params["wo"].T.astype(jnp.bfloat16),
        "bo": params["bo"].reshape(1, D).astype(jnp.float32),
    }


def multi_head_attention(xq, xk, xv, prepared, *, h,
                         q_tile=512, kv_tile=512, proj_tile=512):
    """xq/xk/xv: (B, S, d_model) float32.  Returns (B, S, d_model) float32."""
    B, S, D = xq.shape
    assert D % h == 0
    vmem_limit = _vmem_limit_bytes()

    # cast activations once (halves activation DMA; all accumulation stays f32)
    xq = xq.astype(jnp.bfloat16)
    xk = xk.astype(jnp.bfloat16)
    xv = xv.astype(jnp.bfloat16)

    # 1) project Q (pre-scaled) / K / V for the whole sequence exactly once
    q, k, v = qkv_projection(xq, xk, xv, prepared,
                             seq_tile=proj_tile, vmem_limit=vmem_limit)

    # 2) flash attention + fused output projection
    return flash_attention_outproj(q, k, v, prepared, h=h,
                                   q_tile=q_tile, kv_tile=kv_tile,
                                   vmem_limit=vmem_limit)


# ---------------------------------------------------------------------------
# Pure-JAX reference & test harness
# ---------------------------------------------------------------------------
def reference_mha(xq, xk, xv, params, *, h):
    """Pure-JAX f32 reference mirroring the PyTorch forward (dropout off, mask=None)."""
    B, S, D = xq.shape
    d_k = D // h

    def lin(x, w, b):
        return jnp.einsum("bsd,od->bso", x, w) + b

    q = lin(xq, params["wq"], params["bq"]).reshape(B, S, h, d_k).transpose(0, 2, 1, 3)
    k = lin(xk, params["wk"], params["bk"]).reshape(B, S, h, d_k).transpose(0, 2, 1, 3)
    v = lin(xv, params["wv"], params["bv"]).reshape(B, S, h, d_k).transpose(0, 2, 1, 3)

    scores = jnp.einsum("bhqd,bhkd->bhqk", q, k) / math.sqrt(d_k)
    p = jax.nn.softmax(scores, axis=-1)
    x = jnp.einsum("bhqk,bhkd->bhqd", p, v)
    x = x.transpose(0, 2, 1, 3).reshape(B, S, D)
    return lin(x, params["wo"], params["bo"])


def init_params(key, d_model):
    ks = jax.random.split(key, 8)
    scale = 1.0 / math.sqrt(d_model)
    return {
        "wq": jax.random.uniform(ks[0], (d_model, d_model), jnp.float32, -scale, scale),
        "bq": jax.random.uniform(ks[1], (d_model,), jnp.float32, -scale, scale),
        "wk": jax.random.uniform(ks[2], (d_model, d_model), jnp.float32, -scale, scale),
        "bk": jax.random.uniform(ks[3], (d_model,), jnp.float32, -scale, scale),
        "wv": jax.random.uniform(ks[4], (d_model, d_model), jnp.float32, -scale, scale),
        "bv": jax.random.uniform(ks[5], (d_model,), jnp.float32, -scale, scale),
        "wo": jax.random.uniform(ks[6], (d_model, d_model), jnp.float32, -scale, scale),
        "bo": jax.random.uniform(ks[7], (d_model,), jnp.float32, -scale, scale),
    }


if __name__ == "__main__":
    d_model, h = 32, 4

    key = jax.random.PRNGKey(0)
    kp, kq, kk, kv, kq2, kk2, kv2 = jax.random.split(key, 7)
    params = init_params(kp, d_model)
    prepared = prepare_params(params, h=h)   # one-time repack (bf16, scale folded)

    # bf16 MXU operands with f32 accumulation -> loosened tolerance vs f32 reference.
    TOL = 5e-2

    # --- test 1: single-tile path (B=2, S=8) --------------------------------
    B, S = 2, 8
    xq = jax.random.normal(kq, (B, S, d_model), jnp.float32)
    xk = jax.random.normal(kk, (B, S, d_model), jnp.float32)
    xv = jax.random.normal(kv, (B, S, d_model), jnp.float32)

    out = jax.block_until_ready(multi_head_attention(xq, xk, xv, prepared, h=h))
    ref = reference_mha(xq, xk, xv, params, h=h)
    assert out.shape == (B, S, d_model)
    assert jnp.allclose(out, ref, rtol=TOL, atol=TOL), "mismatch vs reference (single tile)"

    # --- test 2: multi-tile path exercising the online softmax (S=16, tiles=8)
    B, S = 2, 16
    xq = jax.random.normal(kq2, (B, S, d_model), jnp.float32)
    xk = jax.random.normal(kk2, (B, S, d_model), jnp.float32)
    xv = jax.random.normal(kv2, (B, S, d_model), jnp.float32)

    out = jax.block_until_ready(
        multi_head_attention(xq, xk, xv, prepared, h=h,
                             q_tile=8, kv_tile=8, proj_tile=8))
    ref = reference_mha(xq, xk, xv, params, h=h)
    assert out.shape == (B, S, d_model)
    assert jnp.allclose(out, ref, rtol=TOL, atol=TOL), "mismatch vs reference (multi tile)"

    print("KERNEL_OK")
</pallas_src>

<mosaic_0001>
module attributes {stable_mosaic.version = 11 : i64} {
  func.func @qkv_proj_kernel(%arg0: i32, %arg1: i32, %arg2: memref<1x8x32xbf16, #tpu.memory_space<vmem>>, %arg3: memref<1x8x32xbf16, #tpu.memory_space<vmem>>, %arg4: memref<1x8x32xbf16, #tpu.memory_space<vmem>>, %arg5: memref<32x32xbf16, #tpu.memory_space<vmem>>, %arg6: memref<32x32xbf16, #tpu.memory_space<vmem>>, %arg7: memref<32x32xbf16, #tpu.memory_space<vmem>>, %arg8: memref<1x32xf32, #tpu.memory_space<vmem>>, %arg9: memref<1x32xf32, #tpu.memory_space<vmem>>, %arg10: memref<1x32xf32, #tpu.memory_space<vmem>>, %arg11: memref<1x8x32xbf16, #tpu.memory_space<vmem>>, %arg12: memref<1x8x32xbf16, #tpu.memory_space<vmem>>, %arg13: memref<1x8x32xbf16, #tpu.memory_space<vmem>>) attributes {dimension_semantics = [#tpu.dimension_semantics<parallel>, #tpu.dimension_semantics<parallel>], iteration_bounds = array<i64: 2, 1>, scalar_prefetch = 0 : i64, scratch_operands = 0 : i64, tpu.core_type = #tpu.core_type<tc>, window_params = [{transform_indices = @transform_0, window_bounds = array<i64: 1, 8, 32>}, {transform_indices = @transform_1, window_bounds = array<i64: 1, 8, 32>}, {transform_indices = @transform_2, window_bounds = array<i64: 1, 8, 32>}, {pipeline_mode = #tpu.pipeline_mode<synchronous>, transform_indices = @transform_3, window_bounds = array<i64: 32, 32>}, {pipeline_mode = #tpu.pipeline_mode<synchronous>, transform_indices = @transform_4, window_bounds = array<i64: 32, 32>}, {pipeline_mode = #tpu.pipeline_mode<synchronous>, transform_indices = @transform_5, window_bounds = array<i64: 32, 32>}, {pipeline_mode = #tpu.pipeline_mode<synchronous>, transform_indices = @transform_6, window_bounds = array<i64: 1, 32>}, {pipeline_mode = #tpu.pipeline_mode<synchronous>, transform_indices = @transform_7, window_bounds = array<i64: 1, 32>}, {pipeline_mode = #tpu.pipeline_mode<synchronous>, transform_indices = @transform_8, window_bounds = array<i64: 1, 32>}, {transform_indices = @transform_9, window_bounds = array<i64: 1, 8, 32>}, {transform_indices = @transform_10, window_bounds = array<i64: 1, 8, 32>}, {transform_indices = @transform_11, window_bounds = array<i64: 1, 8, 32>}]} {
    %c0 = arith.constant 0 : index
    %c0_0 = arith.constant 0 : index
    %c0_1 = arith.constant 0 : index
    %0 = vector.load %arg2[%c0, %c0_0, %c0_1] : memref<1x8x32xbf16, #tpu.memory_space<vmem>>, vector<1x8x32xbf16>
    %1 = vector.shape_cast %0 : vector<1x8x32xbf16> to vector<8x32xbf16>
    %c0_2 = arith.constant 0 : index
    %c0_3 = arith.constant 0 : index
    %2 = vector.load %arg5[%c0_2, %c0_3] : memref<32x32xbf16, #tpu.memory_space<vmem>>, vector<32x32xbf16>
    %cst = arith.constant dense<0.000000e+00> : vector<8x32xf32>
    %3 = tpu.matmul %1, %2, %cst {dimension_numbers = #tpu.dot_dimension_numbers<[1], [0], [0], [1], [0, 0, 1, 1], [], []>} : vector<8x32xbf16>, vector<32x32xbf16>, vector<8x32xf32> -> vector<8x32xf32>
    %c0_4 = arith.constant 0 : index
    %c0_5 = arith.constant 0 : index
    %c0_6 = arith.constant 0 : index
    %4 = vector.load %arg3[%c0_4, %c0_5, %c0_6] : memref<1x8x32xbf16, #tpu.memory_space<vmem>>, vector<1x8x32xbf16>
    %5 = vector.shape_cast %4 : vector<1x8x32xbf16> to vector<8x32xbf16>
    %c0_7 = arith.constant 0 : index
    %c0_8 = arith.constant 0 : index
    %6 = vector.load %arg6[%c0_7, %c0_8] : memref<32x32xbf16, #tpu.memory_space<vmem>>, vector<32x32xbf16>
    %cst_9 = arith.constant dense<0.000000e+00> : vector<8x32xf32>
    %7 = tpu.matmul %5, %6, %cst_9 {dimension_numbers = #tpu.dot_dimension_numbers<[1], [0], [0], [1], [0, 0, 1, 1], [], []>} : vector<8x32xbf16>, vector<32x32xbf16>, vector<8x32xf32> -> vector<8x32xf32>
    %c0_10 = arith.constant 0 : index
    %c0_11 = arith.constant 0 : index
    %c0_12 = arith.constant 0 : index
    %8 = vector.load %arg4[%c0_10, %c0_11, %c0_12] : memref<1x8x32xbf16, #tpu.memory_space<vmem>>, vector<1x8x32xbf16>
    %9 = vector.shape_cast %8 : vector<1x8x32xbf16> to vector<8x32xbf16>
    %c0_13 = arith.constant 0 : index
    %c0_14 = arith.constant 0 : index
    %10 = vector.load %arg7[%c0_13, %c0_14] : memref<32x32xbf16, #tpu.memory_space<vmem>>, vector<32x32xbf16>
    %cst_15 = arith.constant dense<0.000000e+00> : vector<8x32xf32>
    %11 = tpu.matmul %9, %10, %cst_15 {dimension_numbers = #tpu.dot_dimension_numbers<[1], [0], [0], [1], [0, 0, 1, 1], [], []>} : vector<8x32xbf16>, vector<32x32xbf16>, vector<8x32xf32> -> vector<8x32xf32>
    %c0_16 = arith.constant 0 : index
    %c0_17 = arith.constant 0 : index
    %12 = vector.load %arg8[%c0_16, %c0_17] : memref<1x32xf32, #tpu.memory_space<vmem>>, vector<1x32xf32>
    %13 = vector.broadcast %12 : vector<1x32xf32> to vector<8x32xf32>
    %14 = arith.addf %3, %13 : vector<8x32xf32>
    %15 = arith.truncf %14 : vector<8x32xf32> to vector<8x32xbf16>
    %c0_18 = arith.constant 0 : index
    %c0_19 = arith.constant 0 : index
    %c0_20 = arith.constant 0 : index
    %16 = vector.load %arg11[%c0_18, %c0_19, %c0_20] : memref<1x8x32xbf16, #tpu.memory_space<vmem>>, vector<1x8x32xbf16>
    %17 = vector.shape_cast %16 : vector<1x8x32xbf16> to vector<8x32xbf16>
    %18 = vector.shape_cast %15 : vector<8x32xbf16> to vector<1x8x32xbf16>
    tpu.vector_store %arg11[%c0_18, %c0_19, %c0_20], %18 {strides = array<i32>} : memref<1x8x32xbf16, #tpu.memory_space<vmem>>, vector<1x8x32xbf16>,
    %c0_21 = arith.constant 0 : index
    %c0_22 = arith.constant 0 : index
    %19 = vector.load %arg9[%c0_21, %c0_22] : memref<1x32xf32, #tpu.memory_space<vmem>>, vector<1x32xf32>
    %20 = vector.broadcast %19 : vector<1x32xf32> to vector<8x32xf32>
    %21 = arith.addf %7, %20 : vector<8x32xf32>
    %22 = arith.truncf %21 : vector<8x32xf32> to vector<8x32xbf16>
    %c0_23 = arith.constant 0 : index
    %c0_24 = arith.constant 0 : index
    %c0_25 = arith.constant 0 : index
    %23 = vector.load %arg12[%c0_23, %c0_24, %c0_25] : memref<1x8x32xbf16, #tpu.memory_space<vmem>>, vector<1x8x32xbf16>
    %24 = vector.shape_cast %23 : vector<1x8x32xbf16> to vector<8x32xbf16>
    %25 = vector.shape_cast %22 : vector<8x32xbf16> to vector<1x8x32xbf16>
    tpu.vector_store %arg12[%c0_23, %c0_24, %c0_25], %25 {strides = array<i32>} : memref<1x8x32xbf16, #tpu.memory_space<vmem>>, vector<1x8x32xbf16>,
    %c0_26 = arith.constant 0 : index
    %c0_27 = arith.constant 0 : index
    %26 = vector.load %arg10[%c0_26, %c0_27] : memref<1x32xf32, #tpu.memory_space<vmem>>, vector<1x32xf32>
    %27 = vector.broadcast %26 : vector<1x32xf32> to vector<8x32xf32>
    %28 = arith.addf %11, %27 : vector<8x32xf32>
    %29 = arith.truncf %28 : vector<8x32xf32> to vector<8x32xbf16>
    %c0_28 = arith.constant 0 : index
    %c0_29 = arith.constant 0 : index
    %c0_30 = arith.constant 0 : index
    %30 = vector.load %arg13[%c0_28, %c0_29, %c0_30] : memref<1x8x32xbf16, #tpu.memory_space<vmem>>, vector<1x8x32xbf16>
    %31 = vector.shape_cast %30 : vector<1x8x32xbf16> to vector<8x32xbf16>
    %32 = vector.shape_cast %29 : vector<8x32xbf16> to vector<1x8x32xbf16>
    tpu.vector_store %arg13[%c0_28, %c0_29, %c0_30], %32 {strides = array<i32>} : memref<1x8x32xbf16, #tpu.memory_space<vmem>>, vector<1x8x32xbf16>,
    return
  }
  func.func @transform_0(%arg0: i32, %arg1: i32) -> (i32, i32, i32) {
    %c0_i32 = arith.constant 0 : i32
    %c0_i32_0 = arith.constant 0 : i32
    return %arg0, %arg1, %c0_i32 : i32, i32, i32
  }
  func.func @transform_1(%arg0: i32, %arg1: i32) -> (i32, i32, i32) {
    %c0_i32 = arith.constant 0 : i32
    %c0_i32_0 = arith.constant 0 : i32
    return %arg0, %arg1, %c0_i32 : i32, i32, i32
  }
  func.func @transform_2(%arg0: i32, %arg1: i32) -> (i32, i32, i32) {
    %c0_i32 = arith.constant 0 : i32
    %c0_i32_0 = arith.constant 0 : i32
    return %arg0, %arg1, %c0_i32 : i32, i32, i32
  }
  func.func @transform_3(%arg0: i32, %arg1: i32) -> (i32, i32) {
    %c0_i32 = arith.constant 0 : i32
    %c0_i32_0 = arith.constant 0 : i32
    %c0_i32_1 = arith.constant 0 : i32
    return %c0_i32, %c0_i32_0 : i32, i32
  }
  func.func @transform_4(%arg0: i32, %arg1: i32) -> (i32, i32) {
    %c0_i32 = arith.constant 0 : i32
    %c0_i32_0 = arith.constant 0 : i32
    %c0_i32_1 = arith.constant 0 : i32
    return %c0_i32, %c0_i32_0 : i32, i32
  }
  func.func @transform_5(%arg0: i32, %arg1: i32) -> (i32, i32) {
    %c0_i32 = arith.constant 0 : i32
    %c0_i32_0 = arith.constant 0 : i32
    %c0_i32_1 = arith.constant 0 : i32
    return %c0_i32, %c0_i32_0 : i32, i32
  }
  func.func @transform_6(%arg0: i32, %arg1: i32) -> (i32, i32) {
    %c0_i32 = arith.constant 0 : i32
    %c0_i32_0 = arith.constant 0 : i32
    %c0_i32_1 = arith.constant 0 : i32
    return %c0_i32, %c0_i32_0 : i32, i32
  }
  func.func @transform_7(%arg0: i32, %arg1: i32) -> (i32, i32) {
    %c0_i32 = arith.constant 0 : i32
    %c0_i32_0 = arith.constant 0 : i32
    %c0_i32_1 = arith.constant 0 : i32
    return %c0_i32, %c0_i32_0 : i32, i32
  }
  func.func @transform_8(%arg0: i32, %arg1: i32) -> (i32, i32) {
    %c0_i32 = arith.constant 0 : i32
    %c0_i32_0 = arith.constant 0 : i32
    %c0_i32_1 = arith.constant 0 : i32
    return %c0_i32, %c0_i32_0 : i32, i32
  }
  func.func @transform_9(%arg0: i32, %arg1: i32) -> (i32, i32, i32) {
    %c0_i32 = arith.constant 0 : i32
    %c0_i32_0 = arith.constant 0 : i32
    return %arg0, %arg1, %c0_i32 : i32, i32, i32
  }
  func.func @transform_10(%arg0: i32, %arg1: i32) -> (i32, i32, i32) {
    %c0_i32 = arith.constant 0 : i32
    %c0_i32_0 = arith.constant 0 : i32
    return %arg0, %arg1, %c0_i32 : i32, i32, i32
  }
  func.func @transform_11(%arg0: i32, %arg1: i32) -> (i32, i32, i32) {
    %c0_i32 = arith.constant 0 : i32
    %c0_i32_0 = arith.constant 0 : i32
    return %arg0, %arg1, %c0_i32 : i32, i32, i32
  }
}

</mosaic_0001>

<bundles_post_ra>
// kernel: tpu_custom_call.1
= control target key start
LH: loop header
LB: loop body
LE: loop exit
PB: predicated region body
PF: predicated region fallthrough
CT: control target
= control target key end

     0   :  { %s1998_s0 = inlined_call_operand.hbm [shape: bf16[2,8,32], index: 0, kind: input, shape index: {}]   ;;  %s1999_s1 = inlined_call_operand.hbm [shape: bf16[2,8,32], index: 1, kind: input, shape index: {}]   ;;  %s2000_s2 = inlined_call_operand.hbm [shape: bf16[2,8,32], index: 2, kind: input, shape index: {}]   ;;  %s2001_s3 = inlined_call_operand.hbm [shape: bf16[32,32], index: 3, kind: input, shape index: {}]   ;;  %s2002_s4 = inlined_call_operand.hbm [shape: bf16[32,32], index: 4, kind: input, shape index: {}]   ;;  %s2003_s5 = inlined_call_operand.vmem [shape: bf16[32,32], index: 5, kind: input, shape index: {}]   ;;  %s2004_s6 = inlined_call_operand.vmem [shape: f32[1,32], index: 6, kind: input, shape index: {}]   ;;  %s2005_s7 = inlined_call_operand.vmem [shape: f32[1,32], index: 7, kind: input, shape index: {}]   ;;  %s2006_s8 = inlined_call_operand.vmem [shape: f32[1,32], index: 8, kind: input, shape index: {}]   ;;  %s2007_s9 = inlined_call_operand.hbm [shape: bf16[2,8,32], index: 9, kind: output, shape index: {0}]   ;;  %s2008_s10 = inlined_call_operand.hbm [shape: bf16[2,8,32], index: 10, kind: output, shape index: {1}]   ;;  %s2009_s11 = inlined_call_operand.hbm [shape: bf16[2,8,32], index: 11, kind: output, shape index: {2}]  }
   0x1   :  { %2033 = sst [smem:[#allocation26_spill]] %s1999_s1 }
   0x2   :  { %2034 = sst [smem:[#allocation27_spill]] %s2001_s3 }
   0x3   :  { %2035 = sst [smem:[#allocation28_spill]] %s2002_s4 }
   0x4   :  { %2036 = sst [smem:[#allocation29_spill]] %s2006_s8 }
   0x5   :  { %2037 = sst [smem:[#allocation30_spill]] %s2008_s10 }
   0x6   :  { %2038 = sst [smem:[#allocation31_spill]] %s2009_s11 }
   0x7   :  { %17 = vsyncpa [#allocation3], 0 }
   0x8   :  { %19 = vsyncpa [#allocation3 + $0x1], 0 }
   0x9   :  { %20 = vsyncpa [#allocation6], 0 }
   0xa   :  { %22 = vsyncpa [#allocation6 + $0x1], 0 }
   0xb   :  { %23 = vsyncpa [#allocation9], 0 }
   0xc   :  { %24 = vsyncpa [#allocation4], 0 }
   0xd   :  { %26 = vsyncpa [#allocation4 + $0x1], 0 }
   0xe   :  { %27 = vsyncpa [#allocation13], 0 }
   0xf   :  { %29 = vsyncpa [#allocation13 + $0x1], 0  ;;  %s1574_s17 = smov 0   ;;  %s1576_s18 = smov 0  }
  0x10   :  { %s1578_s19 = smov 0   ;;  %s1580_s20 = smov 0  }
  0x11   :  { %s1582_s21 = smov 0   ;;  %s1584_s22 = smov 0  }
  0x12 LB: > { %2039 = sst [smem:[#allocation20_spill]] %s1480_s17  ;;  %s1605_s23 = sadd.s32 4294967295, %s1500_s22   ;;  %s1500_s22 = sphi %s1584_s22, %s35_s22   ;;  %s1496_s21 = sphi %s1582_s21, %s2081_s21   ;;  %s1492_s20 = sphi %s1580_s20, %s2080_s20   ;;  %s1488_s19 = sphi %s1578_s19, %s2084_s19   ;;  %s1484_s18 = sphi %s1576_s18, %s2083_s18   ;;  %s1480_s17 = sphi %s1574_s17, %s2082_s17  }
  0x13   : > { %2040 = sst [smem:[#allocation21_spill]] %s1496_s21  ;;  %s2010_s24 = sadd.s32 4294967294, %s1500_s22  }
  0x14   : > { %2041 = sst [smem:[#allocation22_spill]] %s1500_s22  ;;  %p69_p0 = scmp.ne.s32.totalorder %s1484_s18, %s1480_s17 }
  0x15   : > { %p2013_p1 = scmp.eq.s32.totalorder %s1605_s23, 0  ;;  %p283_p3 = scmp.eq.s32.totalorder %s2010_s24, 1 }
  0x16   : > { %p1019_p5 = scmp.ge.s32.totalorder %s1500_s22, 1  ;;  %p346_p7 = scmp.lt.s32.totalorder %s1500_s22, 3 }
  0x17   : > { %p1616_p4 = por %p2013_p1, %p69_p0  ;;  %p1621_p6 = por %p283_p3, %p69_p0 }
  0x18   : > { %p1626_p8 = pnand %p1019_p5, %p346_p7  ;;  %s1502_s28 = smov [#allocation8]  }
  0x19   : > { %s2042_s25 = scalar_select %p1616_p4, 1, 0 }
  0x1a   : > { %s2043_s26 = scalar_select %p1621_p6, 1, 0 }
  0x1b   : > { %s2045_s27 = scalar_select %p1626_p8, 1, 0 }
  0x1c   : > { %2044 = sst [smem:[#allocation23_spill]] %s2043_s26  ;;  %s358_s29 = sshll.u32 %s1502_s28, 4  ;;  %s359_s29 = int_to_ptr.vmem [resolvable:$true] %s358_s29 }
  0x1d   : > { %p1111_p9 = pneg %p1626_p8  ;;  %s47_s12 = sadd.s32 1, %s1496_s21 }
  0x1e   : > { %s2047_s3 = sld [smem:[#allocation27_spill]] }
  0x1f   : > { %p1635_p11 = pnand %p1111_p9, %p2013_p1 }
  0x21   : > { %s2046_s30 = scalar_select %p1635_p11, 1, 0 }
  0x22   : > { %p2025_p13 = pneg %p1635_p11 }
  0x24   : > { %s1204_s15 = scalar_lea.hbm %s2047_s3, 256 }
  0x25   : > { %p1205_p12 = scmp.ne.s32.totalorder %s2047_s3, %s1204_s15  ;;  %p1211_p5 = scmp.lt.u32.totalorder %s1204_s15, %s2047_s3 }
  0x27   : > { %p1207_p0 = pnand %p2025_p13, %p1205_p12 }
  0x29   : > { %p1208_p3 = pneg %p1207_p0 }
  0x2b   : > { %p1213_p7 = pnand %p1211_p5, %p1208_p3 }
  0x2d   : > { %1216 = shalt.err (!%p1213_p7)
}
  0x2e   : > { %s1217_s17 = scalar_lea.vmem %s359_s29, 256  ;;  %p1225_p2 = scmp.lt.s32.totalorder %s359_s29, %s359_s29 }
  0x2f   : > { %p1218_p9 = scmp.ne.s32.totalorder %s359_s29, %s1217_s17  ;;  %p1226_p6 = scmp.lt.s32.totalorder %s1217_s17, %s1217_s17 }
  0x31   : > { %p1220_p10 = pnand %p1218_p9, %p2025_p13  ;;  %p1227_p4 = por %p1226_p6, %p1225_p2 }
  0x33   : > { %p1221_p1 = pneg %p1220_p10 }
  0x35   : > { %p1228_p8 = pnand %p1227_p4, %p1221_p1 }
  0x37   : > { %1231 = shalt.err (!%p1228_p8)
}
  0x38   : > { %s2016_s24 = smov 64   ;;  %s2017_s26 = smov 4  }
  0x39   : > { %1114 = dma.hbm_to_vmem [thread:$0]  (!%p1635_p11), %s2047_s3, 256, %s359_s29, [#allocation9], %s2016_s24, %s2016_s24, %s2017_s26  }
  0x3a   : > { %p49_p1 = scmp.ge.s32.totalorder %s47_s12, 2  ;;  %s56_s14 = sadd.s32 1, %s1488_s19 }
  0x3b   : > { %p63_p2 = scmp.ne.s32.totalorder %s1488_s19, %s1484_s18  ;;  %p64_p4 = scmp.eq.s32.totalorder %s1500_s22, 0 }
  0x3c   : > { %s2086_s12 = smov (%p49_p1, %s47_s12), 0  ;;  %p2049_p8 = scmp.eq.s32.totalorder %s1605_s23, 1 }
  0x3d   : > { %2048 = sst [smem:[#allocation24_spill]] %s2086_s12  ;;  %p65_p6 = por %p64_p4, %p63_p2 }
  0x3e   : > { %p1673_p10 = por %p2049_p8, %p63_p2  ;;  %s51_s16 = ssub.s32 %s1496_s21, %s2086_s12 }
  0x3f   : > { %p1140_p12 = scmp.lt.s32.totalorder %s1500_s22, 2  ;;  %p54_p0 = scmp.eq.s32.totalorder %s51_s16, 0 }
  0x40   : > { %s2050_s15 = scalar_select %p1673_p10, 1, 0 }
  0x41   : > { %s2019_s28 = sand.u32 1, %s1488_s19   ;;  %s1686_s17 = sshll.u32 %s1496_s21, 6 }
  0x42   : > { %s1683_s29 = sshll.u32 %s2019_s28, 2  ;;  %p1691_p3 = pnand %p1140_p12, %p65_p6 }
  0x43   : > { %s1689_s13 = scalar_select %p54_p0, %s1488_s19, %s56_s14  }
  0x44   : > { %s2052_s24 = scalar_select %p1691_p3, 1, 0 }
  0x45   : > { %2051 = sst [smem:[#allocation25_spill]] %s1689_s13  ;;  %s416_s26 = sand.u32 1, %s1500_s22  }
  0x46   : > { %s2053_s1 = sld [smem:[#allocation26_spill]]  ;;  %s420_s28 = scalar_lea.vmem [#allocation5], %s1683_s29 }
  0x47   : > { %s428_s21 = sshll.u32 %s420_s28, 4  ;;  %s1505_s14 = smov [#allocation10]   ;;  %s1703_s21 = int_to_ptr.vmem [resolvable:$true] %s428_s21 }
  0x48   : > { %s1705_s13 = sshll.u32 %s1505_s14, 4  ;;  %s1707_s11 = scalar_lea.sflag [#allocation6], %s416_s26  ;;  %s372_s13 = int_to_ptr.vmem [resolvable:$true] %s1705_s13 }
  0x49   : > { %p1713_p7 = pneg %p1691_p3 }
  0x4b   : > { %s2054_s3 = scalar_select %p1713_p7, 1, 0 }
  0x4c   : > { %s1700_s16 = scalar_lea.hbm %s2053_s1, %s1686_s17  ;;  %s1237_s22 = scalar_lea.hbm %s2053_s1, 128 }
  0x4d   : > { %s1232_s8 = scalar_lea.hbm %s1700_s16, 64  ;;  %p1238_p2 = scmp.lt.u32.totalorder %s1700_s16, %s2053_s1 }
  0x4e   : > { %p1233_p5 = scmp.ne.s32.totalorder %s1700_s16, %s1232_s8  ;;  %p1239_p4 = scmp.lt.u32.totalorder %s1237_s22, %s1232_s8 }
  0x4f   : > { %p1241_p8 = scmp.lt.u32.totalorder %s1232_s8, %s1700_s16 }
  0x50   : > { %p1235_p9 = pnand %p1713_p7, %p1233_p5  ;;  %p1240_p6 = por %p1239_p4, %p1238_p2 }
  0x52   : > { %p1236_p1 = pneg %p1235_p9  ;;  %p1242_p12 = por %p1241_p8, %p1240_p6 }
  0x54   : > { %p1243_p0 = pnand %p1242_p12, %p1236_p1 }
  0x56   : > { %1246 = shalt.err (!%p1243_p0)
}
  0x57   : > { %s1247_s26 = scalar_lea.vmem %s1703_s21, 64  ;;  %s1506_s12 = smov [#allocation5]  }
  0x58   : > { %p1248_p5 = scmp.ne.s32.totalorder %s1703_s21, %s1247_s26  ;;  %s1252_s28 = sshll.u32 %s1506_s12, 4  ;;  %s1253_s28 = int_to_ptr.vmem [resolvable:$false] %s1252_s28 }
  0x59   : > { %s1254_s10 = scalar_lea.vmem %s1253_s28, 128  ;;  %p1255_p10 = scmp.lt.s32.totalorder %s1703_s21, %s1253_s28 }
  0x5a   : > { %p1250_p9 = pnand %p1248_p5, %p1713_p7  ;;  %p1256_p11 = scmp.lt.s32.totalorder %s1254_s10, %s1247_s26 }
  0x5c   : > { %p1251_p13 = pneg %p1250_p9  ;;  %p1257_p2 = por %p1256_p11, %p1255_p10 }
  0x5e   : > { %p1258_p4 = pnand %p1257_p2, %p1251_p13 }
  0x60   : > { %1261 = shalt.err (!%p1258_p4)
}
  0x61   : > { %1124 = dma.hbm_to_vmem [thread:$0]  (!%p1691_p3), %s1700_s16, 64, %s1703_s21, %s1707_s11  }
  0x62   : > { %s2055_s4 = sld [smem:[#allocation28_spill]]  ;;  %p2056_p11 = scmp.ne.s32.totalorder %s2046_s30, 0 }
  0x64   : > { %p2057_p13 = pneg %p2056_p11 }
  0x68   : > { %s1262_s14 = scalar_lea.hbm %s2055_s4, 256 }
  0x69   : > { %p1263_p1 = scmp.ne.s32.totalorder %s2055_s4, %s1262_s14  ;;  %p1269_p8 = scmp.lt.u32.totalorder %s1262_s14, %s2055_s4 }
  0x6b   : > { %p1265_p10 = pnand %p1263_p1, %p2057_p13 }
  0x6d   : > { %p1266_p6 = pneg %p1265_p10 }
  0x6f   : > { %p1271_p12 = pnand %p1269_p8, %p1266_p6 }
  0x71   : > { %1274 = shalt.err (!%p1271_p12)
}
  0x72   : > { %s1275_s21 = scalar_lea.vmem %s372_s13, 256  ;;  %p2058_p5 = pmov %p2057_p13 }
  0x73   : > { %p1276_p0 = scmp.ne.s32.totalorder %s372_s13, %s1275_s21  ;;  %p1283_p4 = scmp.lt.s32.totalorder %s372_s13, %s372_s13 }
  0x74   : > { %p1284_p3 = scmp.lt.s32.totalorder %s1275_s21, %s1275_s21 }
  0x75   : > { %p1278_p9 = pnand %p1276_p0, %p2058_p5 }
  0x76   : > { %p1285_p7 = por %p1284_p3, %p1283_p4 }
  0x77   : > { %p1279_p2 = pneg %p1278_p9 }
  0x79   : > { %p1286_p1 = pnand %p1285_p7, %p1279_p2 }
  0x7b   : > { %1289 = shalt.err (!%p1286_p1)
}
  0x7c   : > { %s2059_s1 = smov 4   ;;  %s2060_s16 = smov 64  }
  0x7d   : > { %1117 = dma.hbm_to_vmem [thread:$0]  (!%p2056_p11), %s2055_s4, 256, %s372_s13, [#allocation9], %s2060_s16, %s2060_s16, %s2059_s1  }
  0x7e   : > { %s1765_s12 = scalar_lea.hbm %s1998_s0, %s1686_s17  ;;  %s401_s30 = scalar_lea.vmem [#allocation2], %s1683_s29 }
  0x7f   : > { %s409_s26 = sshll.u32 %s401_s30, 4  ;;  %s1774_s10 = scalar_lea.hbm %s2000_s2, %s1686_s17  ;;  %s1768_s26 = int_to_ptr.vmem [resolvable:$true] %s409_s26 }
  0x80   : > { %s2061_s8 = sand.u32 1, %s1488_s19   ;;  %s1290_s1 = scalar_lea.hbm %s1765_s12, 64 }
  0x81   : > { %s398_s13 = scalar_lea.sflag [#allocation3], %s2061_s8  ;;  %p1291_p3 = scmp.ne.s32.totalorder %s1765_s12, %s1290_s1 }
  0x82   : > { %p2062_p7 = scmp.ne.s32.totalorder %s2054_s3, 0  ;;  %s1295_s14 = scalar_lea.hbm %s1998_s0, 128 }
  0x83   : > { %p1296_p10 = scmp.lt.u32.totalorder %s1765_s12, %s1998_s0  ;;  %p1297_p6 = scmp.lt.u32.totalorder %s1295_s14, %s1290_s1 }
  0x84   : > { %p1293_p11 = pnand %p1291_p3, %p2062_p7  ;;  %p1299_p12 = scmp.lt.u32.totalorder %s1290_s1, %s1765_s12 }
  0x85   : > { %p1298_p8 = por %p1297_p6, %p1296_p10 }
  0x86   : > { %p1294_p13 = pneg %p1293_p11 }
  0x87   : > { %p1300_p0 = por %p1299_p12, %p1298_p8 }
  0x89   : > { %p1301_p5 = pnand %p1300_p0, %p1294_p13 }
  0x8b   : > { %1304 = shalt.err (!%p1301_p5)
}
  0x8c   : > { %s1305_s17 = scalar_lea.vmem %s1768_s26, 64  ;;  %s1507_s28 = smov [#allocation2]  }
  0x8d   : > { %p1306_p9 = scmp.ne.s32.totalorder %s1768_s26, %s1305_s17  ;;  %s1310_s21 = sshll.u32 %s1507_s28, 4  ;;  %s1311_s21 = int_to_ptr.vmem [resolvable:$false] %s1310_s21 }
  0x8e   : > { %s1312_s4 = scalar_lea.vmem %s1311_s21, 128  ;;  %p1313_p1 = scmp.lt.s32.totalorder %s1768_s26, %s1311_s21 }
  0x8f   : > { %p1308_p2 = pnand %p1306_p9, %p2062_p7  ;;  %p1314_p3 = scmp.lt.s32.totalorder %s1312_s4, %s1305_s17 }
  0x91   : > { %p1309_p4 = pneg %p1308_p2  ;;  %p1315_p11 = por %p1314_p3, %p1313_p1 }
  0x93   : > { %p1316_p10 = pnand %p1315_p11, %p1309_p4 }
  0x95   : > { %1319 = shalt.err (!%p1316_p10)
}
  0x96   : > { %p2063_p13 = scmp.ne.s32.totalorder %s2052_s24, 0  ;;  %s439_s8 = scalar_lea.vmem [#allocation7], %s1683_s29 }
  0x97   : > { %s447_s1 = sshll.u32 %s439_s8, 4  ;;  %s1320_s16 = scalar_lea.hbm %s1774_s10, 64  ;;  %s448_s1 = int_to_ptr.vmem [resolvable:$true] %s447_s1 }
  0x98   : > { %1121 = dma.hbm_to_vmem [thread:$0]  (!%p2063_p13), %s1765_s12, 64, %s1768_s26, %s398_s13  }
  0x99   : > { %p1321_p6 = scmp.ne.s32.totalorder %s1774_s10, %s1320_s16  ;;  %s1325_s30 = scalar_lea.hbm %s2000_s2, 128 }
  0x9a   : > { %p1326_p0 = scmp.lt.u32.totalorder %s1774_s10, %s2000_s2  ;;  %p1327_p5 = scmp.lt.u32.totalorder %s1325_s30, %s1320_s16 }
  0x9b   : > { %p1323_p8 = pnand %p1321_p6, %p2062_p7  ;;  %p1329_p2 = scmp.lt.u32.totalorder %s1320_s16, %s1774_s10 }
  0x9c   : > { %p1328_p9 = por %p1327_p5, %p1326_p0 }
  0x9d   : > { %p1324_p12 = pneg %p1323_p8 }
  0x9e   : > { %p1330_p4 = por %p1329_p2, %p1328_p9 }
  0xa0   : > { %p1331_p1 = pnand %p1330_p4, %p1324_p12 }
  0xa2   : > { %1334 = shalt.err (!%p1331_p1)
}
  0xa3   : > { %s1335_s29 = scalar_lea.vmem %s448_s1, 64  ;;  %s1508_s12 = smov [#allocation7]  }
  0xa4   : > { %p1336_p3 = scmp.ne.s32.totalorder %s448_s1, %s1335_s29  ;;  %s1340_s26 = sshll.u32 %s1508_s12, 4  ;;  %s1341_s26 = int_to_ptr.vmem [resolvable:$false] %s1340_s26 }
  0xa5   : > { %s1342_s13 = scalar_lea.vmem %s1341_s26, 128  ;;  %p1343_p6 = scmp.lt.s32.totalorder %s448_s1, %s1341_s26 }
  0xa6   : > { %p1338_p11 = pnand %p1336_p3, %p2062_p7  ;;  %p1344_p8 = scmp.lt.s32.totalorder %s1342_s13, %s1335_s29 }
  0xa8   : > { %p1339_p10 = pneg %p1338_p11  ;;  %p1345_p13 = por %p1344_p8, %p1343_p6 }
  0xaa   : > { %p1346_p0 = pnand %p1345_p13, %p1339_p10 }
  0xac   : > { %1349 = shalt.err (!%p1346_p0)
}
  0xad   : > { %p2064_p5 = scmp.ne.s32.totalorder %s2052_s24, 0  ;;  %p2065_p12 = scmp.ne.s32.totalorder %s2045_s27, 0 }
  0xae   : > { %s1821_s3 = sand.u32 (!%p2065_p12), 1, %s1484_s18   ;;  %p2066_p7 = scmp.ne.s32.totalorder (!%p2065_p12), %s2042_s25, 0 }
  0xaf   : > { %1127 = dma.hbm_to_vmem [thread:$0]  (!%p2064_p5), %s1774_s10, 64, %s448_s1, %s1707_s11  }
  0xb0   : > { %456 = sbr.rel (%p2065_p12) target bundleno = 477 (0x1dd), region = 56  ;;  %s1824_s21 = sshll.u32 (!%p2065_p12), %s1821_s3, 2 }
  0xb1   : > { %s459_s4 = scalar_lea.sflag (!%p2065_p12), [#allocation3], %s1821_s3  ;;  %s462_s8 = scalar_lea.vmem (!%p2065_p12), [#allocation2], %s1824_s21 }
  0xb7   : > { %1459 = dma.done.wait (%p2066_p7), %s459_s4, 64  }
  0xb8   : > { %1461 = vsyncadd (%p2066_p7), %s459_s4, 4294967232  ;;  %s467_s11 = sand.u32 1, %s1605_s23   ;;  %s471_s24 = scalar_lea.vmem [#allocation5], %s1824_s21 }
  0xb9   : > { %s468_s27 = scalar_lea.sflag [#allocation6], %s467_s11 }
  0xba   : > { %1463 = dma.done.wait (%p2066_p7), %s468_s27, 128  }
  0xbb   : > { %1465 = vsyncadd (%p2066_p7), %s468_s27, 4294967168  ;;  %s480_s10 = scalar_lea.vmem [#allocation7], %s1824_s21  ;;  %p2067_p13 = scmp.eq.s32.totalorder %s1605_s23, 0 }
  0xbd   : > { %1467 = dma.done.wait (%p2067_p13), [#allocation9], 512   ;;  %p2068_p9 = pmov %p2067_p13 }
  0xbe   : > { %v1509_v0 = vmov 0.0   ;;  %vm1510_vm0 = vmmov 0   ;;  %v1198_v1 = vld [vmem:[#allocation8] sm:$0xff]   ;;  %v1199_v2 = vld [vmem:[#allocation8 + $0x8] sm:$0xff]   ;;  %v1200_v3 = vld [vmem:[#allocation10] sm:$0xff]   ;;  %vm582_vm1 = vcmask 261120  }
  0xbf   : > { %1469 = vsyncadd (%p2068_p9), [#allocation9], 4294966784  ;;  %1067 = vmatprep.subr.bf16.mxu0 %v1509_v0  ;;  %1075 = vmatprep.subr.bf16.mxu1 %v1509_v0  ;;  %v1202_v4 = vld [vmem:[#allocation10 + $0x8] sm:$0xff]   ;;  %v548_v5 = vld [vmem:[%s462_s8] sm:$0xf]  ;;  %s1863_s29 = sshll.u32 %s1492_s20, 6 }
  0xc0   : > { %1071 = vmatprep.mubr.msk.bf16.mxu0 %vm1510_vm0, %v1509_v0  ;;  %1079 = vmatprep.mubr.msk.bf16.mxu1 %vm1510_vm0, %v1509_v0  ;;  %v1201_v6 = vld [vmem:[%s2003_s5] sm:$0xff]   ;;  %v553_v7 = vld [vmem:[%s471_s24] sm:$0xf]  ;;  %v1203_v8 = vld [vmem:[%s2003_s5 + $0x8] sm:$0xff]   ;;  %s532_s12 = scalar_lea.vmem [#allocation11], %s1824_s21  ;;  %vm627_vm2 = vcmask 257024   ;;  %s1873_s27 = scalar_lea.hbm %s2007_s9, %s1863_s29 }
  0xc1   : > { %1068 = vmatpush3.bf16.msra.mxu0 %v1198_v1  ;;  %1076 = vmatpush3.bf16.msra.mxu1 %v1200_v3  ;;  %v558_v9 = vld [vmem:[%s480_s10] sm:$0xf]  ;;  %s782_s26 = sshll.u32 %s532_s12, 4  ;;  %s539_s13 = scalar_lea.vmem [#allocation12], %s1824_s21  ;;  %s1875_s26 = int_to_ptr.vmem [resolvable:$true] %s782_s26 }
  0xc2   : > { %1069 = vmatprep.subr.bf16.mxu0 %v1509_v0  ;;  %1077 = vmatprep.subr.bf16.mxu1 %v1509_v0  ;;  %v1038_v10 = vld [vmem:[%s2004_s6] ss:$0 sm:$0xff]  ;;  %s796_s4 = sshll.u32 %s539_s13, 4  ;;  %s2069_s25 = sld [smem:[#allocation30_spill]]  ;;  %s1883_s4 = int_to_ptr.vmem [resolvable:$true] %s796_s4 }
  0xc3   : > { %v1042_v12 = vld [vmem:[%s2005_s7] ss:$0 sm:$0xff]  ;;  %s2070_s14 = sld [smem:[#allocation29_spill]]  ;;  %s758_s30 = scalar_lea.sflag [#allocation4], %s1821_s3 }
  0xc4   : > { %s1350_s17 = scalar_lea.vmem %s1875_s26, 64  ;;  %p2071_p4 = scmp.ne.s32.totalorder %s2050_s15, 0 }
  0xc5   : > { %1070 = vmatpush3.bf16.msra.mxu0 %v1199_v2  ;;  %1078 = vmatpush3.bf16.msra.mxu1 %v1202_v4  ;;  %p1351_p2 = scmp.ne.s32.totalorder %s1875_s26, %s1350_s17  ;;  %s1511_s28 = smov [#allocation11]  }
  0xc6   : > { %1083 = vmatprep.subr.bf16.mxu0 %v1509_v0  ;;  %s1354_s20 = sshll.u32 %s1511_s28, 4  ;;  %s1355_s20 = int_to_ptr.vmem [resolvable:$false] %s1354_s20 }
  0xc7   : > { %p1352_p1 = pnand %p1351_p2, %p2071_p4  ;;  %s1356_s8 = scalar_lea.vmem %s1355_s20, 128 }
  0xc8   : > { %1072 = vmatmul.mubr.msk.bf16.vlgmr.msra.gmra.mrb[0].mxu0 %vm582_vm1, %v548_v5  ;;  %1080 = vmatmul.mubr.msk.bf16.vlgmr.msra.gmra.mrb[0].mxu1 %vm582_vm1, %v553_v7  ;;  %s1881_s1 = scalar_lea.hbm %s2069_s25, %s1863_s29  ;;  %p1357_p11 = scmp.lt.s32.totalorder %s1875_s26, %s1355_s20 }
  0xc9   : > { %1084 = vmatpush3.bf16.msra.mxu0 %v1201_v6  ;;  %1087 = vmatprep.mubr.msk.bf16.mxu0 %vm1510_vm0, %v1509_v0  ;;  %v1046_v24 = vld [vmem:[%s2070_s14] ss:$0 sm:$0xff]  ;;  %p1353_p3 = pneg %p1352_p1  ;;  %p1358_p10 = scmp.lt.s32.totalorder %s1356_s8, %s1350_s17 }
  0xca   : > { %1085 = vmatprep.subr.bf16.mxu0 %v1509_v0 }
  0xcb   : > { %p1359_p6 = por %p1358_p10, %p1357_p11 }
  0xcd   : > { %1086 = vmatpush3.bf16.msra.mxu0 %v1203_v8  ;;  %p1360_p8 = pnand %p1359_p6, %p1353_p3 }
  0xd0   : > { %1088 = vmatmul.mubr.msk.bf16.vlgmr.msra.gmra.mrb[4].mxu0 %vm582_vm1, %v558_v9 }
 0x19b   : > { %v620_v11 = vpop.f32.mrb[0].mxu0  ;;  %v685_v16 = vpop.f32.mrb[0].mxu1 }
 0x19c   : > { %v621_v13 = vadd.f32 %v1038_v10, %v620_v11  ;;  %v1073_v14 = vpop.f32.mrb[1].mxu0  ;;  %v686_v19 = vadd.f32 %v1042_v12, %v685_v16  ;;  %v1081_v20 = vpop.f32.mrb[1].mxu1 }
 0x19d   : > { %v623_v15 = vpop.f32.mrb[2].mxu0  ;;  %v688_v21 = vpop.f32.mrb[2].mxu1 }
 0x19e   : > { %v626_v17 = vpack.c.bf16 %v621_v13, %v621_v13  ;;  %v1074_v18 = vpop.f32.mrb[3].mxu0  ;;  %v691_v22 = vpack.c.bf16 %v686_v19, %v686_v19  ;;  %v1082_v23 = vpop.f32.mrb[3].mxu1 }
 0x1a0   : > { %628 = vst.msk [vmem:[%s532_s12] sm:$0xf] %vm627_vm2, %v626_v17 }
 0x1a1   : > { %1363 = shalt.err (!%p1360_p8)
}
 0x1a2   : > { %s1364_s3 = scalar_lea.hbm %s1873_s27, 64  ;;  %s1368_s10 = scalar_lea.hbm %s2007_s9, 128 }
 0x1a3   : > { %p1365_p0 = scmp.ne.s32.totalorder %s1873_s27, %s1364_s3  ;;  %p1369_p7 = scmp.lt.u32.totalorder %s1873_s27, %s2007_s9 }
 0x1a4   : > { %p1370_p13 = scmp.lt.u32.totalorder %s1368_s10, %s1364_s3  ;;  %p1372_p2 = scmp.lt.u32.totalorder %s1364_s3, %s1873_s27 }
 0x1a5   : > { %p1366_p5 = pnand %p1365_p0, %p2071_p4 }
 0x1a6   : > { %p1371_p9 = por %p1370_p13, %p1369_p7 }
 0x1a7   : > { %p1367_p12 = pneg %p1366_p5 }
 0x1a8   : > { %p1373_p1 = por %p1372_p2, %p1371_p9 }
 0x1aa   : > { %p1374_p3 = pnand %p1373_p1, %p1367_p12 }
 0x1ac   : > { %1377 = shalt.err (!%p1374_p3)
}
 0x1ad   : > { %1105 = dma.vmem_to_hbm [thread:$0]  (%p2071_p4), %s1875_s26, 64, %s1873_s27, %s758_s30   ;;  %692 = vst.msk [vmem:[%s539_s13] sm:$0xf] %vm627_vm2, %v691_v22  ;;  %v749_v25 = vpop.f32.mrb[4].mxu0 }
 0x1ae   : > { %s546_s14 = scalar_lea.vmem [#allocation14], %s1824_s21  ;;  %s1921_s28 = scalar_lea.sflag [#allocation13], %s467_s11 }
 0x1af   : > { %s1917_s17 = sshll.u32 %s546_s14, 4  ;;  %s1378_s20 = scalar_lea.vmem %s1883_s4, 64  ;;  %s811_s17 = int_to_ptr.vmem [resolvable:$true] %s1917_s17 }
 0x1b0   : > { %p1379_p11 = scmp.ne.s32.totalorder %s1883_s4, %s1378_s20  ;;  %s1512_s8 = smov [#allocation12]  }
 0x1b1   : > { %s1382_s3 = sshll.u32 %s1512_s8, 4  ;;  %s1383_s3 = int_to_ptr.vmem [resolvable:$false] %s1382_s3 }
 0x1b2   : > { %p1380_p10 = pnand %p1379_p11, %p2071_p4  ;;  %s1384_s26 = scalar_lea.vmem %s1383_s3, 128 }
 0x1b3   : > { %p1385_p8 = scmp.lt.s32.totalorder %s1883_s4, %s1383_s3  ;;  %p1386_p0 = scmp.lt.s32.totalorder %s1384_s26, %s1378_s20 }
 0x1b4   : > { %p1381_p6 = pneg %p1380_p10 }
 0x1b5   : > { %p1387_p5 = por %p1386_p0, %p1385_p8 }
 0x1b7   : > { %p1388_p12 = pnand %p1387_p5, %p1381_p6 }
 0x1b9   : > { %1391 = shalt.err (!%p1388_p12)
}
 0x1ba   : > { %s1392_s23 = scalar_lea.hbm %s1881_s1, 64  ;;  %s1396_s27 = scalar_lea.hbm %s2069_s25, 128 }
 0x1bb   : > { %p1393_p7 = scmp.ne.s32.totalorder %s1881_s1, %s1392_s23  ;;  %p1397_p2 = scmp.lt.u32.totalorder %s1881_s1, %s2069_s25 }
 0x1bc   : > { %p1398_p1 = scmp.lt.u32.totalorder %s1396_s27, %s1392_s23  ;;  %p1400_p11 = scmp.lt.u32.totalorder %s1392_s23, %s1881_s1 }
 0x1bd   : > { %p1394_p13 = pnand %p1393_p7, %p2071_p4 }
 0x1be   : > { %p1399_p3 = por %p1398_p1, %p1397_p2 }
 0x1bf   : > { %p1395_p9 = pneg %p1394_p13 }
 0x1c0   : > { %p1401_p10 = por %p1400_p11, %p1399_p3 }
 0x1c2   : > { %p1402_p6 = pnand %p1401_p10, %p1395_p9 }
 0x1c4   : > { %1405 = shalt.err (!%p1402_p6)
}
 0x1c5   : > { %1106 = dma.vmem_to_hbm [thread:$0]  (%p2071_p4), %s1883_s4, 64, %s1881_s1, %s1921_s28   ;;  %v750_v26 = vadd.f32 %v1046_v24, %v749_v25  ;;  %v1089_v27 = vpop.f32.mrb[5].mxu0 }
 0x1c6   : > { %v752_v28 = vpop.f32.mrb[6].mxu0  ;;  %s2072_s16 = sld [smem:[#allocation31_spill]]  ;;  %s1406_s20 = scalar_lea.vmem %s811_s17, 64 }
 0x1c7   : > { %v755_v29 = vpack.c.bf16 %v750_v26, %v750_v26  ;;  %v1090_v30 = vpop.f32.mrb[7].mxu0  ;;  %p1407_p8 = scmp.ne.s32.totalorder %s811_s17, %s1406_s20  ;;  %s1513_s4 = smov [#allocation14]  }
 0x1c8   : > { %s1410_s1 = sshll.u32 %s1513_s4, 4  ;;  %s1411_s1 = int_to_ptr.vmem [resolvable:$false] %s1410_s1 }
 0x1c9   : > { %756 = vst.msk [vmem:[%s546_s14] sm:$0xf] %vm627_vm2, %v755_v29  ;;  %p1408_p0 = pnand %p1407_p8, %p2071_p4  ;;  %s1412_s8 = scalar_lea.vmem %s1411_s1, 128 }
 0x1ca   : > { %p1413_p12 = scmp.lt.s32.totalorder %s811_s17, %s1411_s1  ;;  %p1414_p7 = scmp.lt.s32.totalorder %s1412_s8, %s1406_s20 }
 0x1cb   : > { %p1409_p5 = pneg %p1408_p0 }
 0x1cc   : > { %s1949_s22 = scalar_lea.hbm %s2072_s16, %s1863_s29  ;;  %p1415_p13 = por %p1414_p7, %p1413_p12 }
 0x1ce   : > { %p1416_p9 = pnand %p1415_p13, %p1409_p5 }
 0x1d0   : > { %1419 = shalt.err (!%p1416_p9)
}
 0x1d1   : > { %s1420_s21 = scalar_lea.hbm %s1949_s22, 64  ;;  %s1424_s3 = scalar_lea.hbm %s2072_s16, 128 }
 0x1d2   : > { %p1421_p2 = scmp.ne.s32.totalorder %s1949_s22, %s1420_s21  ;;  %p1425_p11 = scmp.lt.u32.totalorder %s1949_s22, %s2072_s16 }
 0x1d3   : > { %p1426_p10 = scmp.lt.u32.totalorder %s1424_s3, %s1420_s21  ;;  %p1428_p8 = scmp.lt.u32.totalorder %s1420_s21, %s1949_s22 }
 0x1d4   : > { %p1422_p1 = pnand %p1421_p2, %p2071_p4 }
 0x1d5   : > { %p1427_p6 = por %p1426_p10, %p1425_p11 }
 0x1d6   : > { %p1423_p3 = pneg %p1422_p1 }
 0x1d7   : > { %p1429_p0 = por %p1428_p8, %p1427_p6 }
 0x1d9   : > { %p1430_p5 = pnand %p1429_p0, %p1423_p3 }
 0x1db   : > { %1433 = shalt.err (!%p1430_p5)
}
 0x1dc   : > { %1107 = dma.vmem_to_hbm [thread:$0]  (%p2071_p4), %s811_s17, 64, %s1949_s22, %s1921_s28  }
 0x1dd PF: > { %s2073_s11 = sld [smem:[#allocation20_spill]]  ;;  %s2074_s13 = sld [smem:[#allocation23_spill]] }
 0x1de   : > { %s2075_s27 = sld [smem:[#allocation22_spill]] }
 0x1e3   : > { %s822_s30 = sand.u32 1, %s2073_s11   ;;  %p2076_p12 = scmp.ne.s32.totalorder %s2074_s13, 0 }
 0x1e4   : > { %p2077_p7 = scmp.ge.s32.totalorder %s2075_s27, 2  ;;  %s823_s12 = scalar_lea.sflag [#allocation4], %s822_s30 }
 0x1e6   : > { %p1129_p13 = pnand %p2077_p7, %p2076_p12 }
 0x1e8   : > { %1471 = dma.done.wait (!%p1129_p13), %s823_s12, 64  }
 0x1e9   : > { %1473 = vsyncadd (!%p1129_p13), %s823_s12, 4294967232  ;;  %s2078_s24 = sadd.s32 4294967294, %s2075_s27  }
 0x1ea   : > { %s831_s10 = sand.u32 1, %s2078_s24  }
 0x1eb   : > { %s832_s20 = scalar_lea.sflag [#allocation13], %s831_s10 }
 0x1ec   : > { %1475 = dma.done.wait (!%p1129_p13), %s832_s20, 128  }
 0x1ed   : > { %1477 = vsyncadd (!%p1129_p13), %s832_s20, 4294967168  ;;  %s35_s22 = sadd.s32 1, %s2075_s27   ;;  %s2079_s15 = sld [smem:[#allocation25_spill]] }
 0x1ee   : > { %p32_p4 = scmp.ge.s32.totalorder %s35_s22, 4   ;;  %s2080_s20 = sld [smem:[#allocation21_spill]] }
 0x1ef   : > { %s2081_s21 = sld [smem:[#allocation24_spill]]  ;;  %s2082_s17 = smov %s1484_s18 }
 0x1f0   : > { %s2083_s18 = smov %s1488_s19  ;;  %34 = sbr.rel (!%p32_p4) target bundleno = 18 (0x12), region = 165 }
 0x1f3   : > { %s2084_s19 = smov %s2079_s15 }
 0x1f7   :  { %846 = vsyncpa [#allocation3], 1 }
 0x1f8   :  { %848 = vsyncpa [#allocation3 + $0x1], 1 }
 0x1f9   :  { %849 = vsyncpa [#allocation6], 1 }
 0x1fa   :  { %851 = vsyncpa [#allocation6 + $0x1], 1 }
 0x1fb   :  { %852 = vsyncpa [#allocation9], 1 }
 0x1fc   :  { %853 = vsyncpa [#allocation4], 1 }
 0x1fd   :  { %855 = vsyncpa [#allocation4 + $0x1], 1 }
 0x1fe   :  { %856 = vsyncpa [#allocation13], 1 }
 0x1ff   :  { %858 = vsyncpa [#allocation13 + $0x1], 1 }

</bundles_post_ra>
